<compile_context>
chip_gen: v6e
topology: v6e:2x2x1
jax: 0.10.0
libtpu: 0.0.40
codegen_flags: <defaults>
</compile_context>

<pallas_src>
import jax
import jax.numpy as jnp
from jax.experimental import pallas as pl
from jax.experimental.pallas import tpu as pltpu


# ---------------------------------------------------------------------------
# Fused kernel: one grid step per batch element, (C, P) activation layout.
# ---------------------------------------------------------------------------
def _sagate_fused_kernel(sar_ref, opt_ref, w1_ref, b1_ref, wg1_ref, wg2_ref,
                         w2_ref, b2_ref, out_ref):
    c = sar_ref.shape[1]
    sar = sar_ref[0]                                     # (C, P)
    opt = opt_ref[0]                                     # (C, P)

    # ---- fusion1: fea_U = W1 @ [sar; opt]   (merged K=2C matmul; bias folded
    #      into the pooling step below, since fea_U only feeds the pools) -----
    x_cat = jnp.concatenate([sar, opt], axis=0)          # (2C, P) sublane stack
    fea_u = jnp.dot(w1_ref[...], x_cat,
                    preferred_element_type=jnp.float32)  # (C, P)

    # ---- global avg + max pool over spatial (lane reduce); +2*b1 is exact ----
    fea_s = (jnp.mean(fea_u, axis=1, keepdims=True)
             + jnp.max(fea_u, axis=1, keepdims=True)
             + 2.0 * b1_ref[...])                        # (C, 1)

    # ---- gate MLP (tiny): contractions as broadcast-mul + reduce -------------
    # hidden_m = relu(sum_c wg1[c, m] * fea_s[c])        -> (1, mid)
    hidden = jnp.maximum(
        jnp.sum(wg1_ref[...] * fea_s, axis=0, keepdims=True), 0.0)
    # logits_o = sum_m wg2[o, m] * hidden[m]             -> (2C, 1)
    logits = jnp.sum(wg2_ref[...] * hidden, axis=1, keepdims=True)

    # ---- pairwise softmax across the two branches ----------------------------
    a0 = logits[:c]                                      # (C, 1)
    a1 = logits[c:]                                      # (C, 1)
    m = jnp.maximum(a0, a1)
    e0 = jnp.exp(a0 - m)
    e1 = jnp.exp(a1 - m)
    denom = e0 + e1
    att0 = e0 / denom
    att1 = e1 / denom

    # ---- fusion2: V = W2 @ [sar*att0; opt*att1] + b2  (merged K=2C matmul) ---
    scaled = jnp.concatenate([sar * att0, opt * att1], axis=0)        # (2C, P)
    out = (jnp.dot(w2_ref[...], scaled, preferred_element_type=jnp.float32)
           + b2_ref[...])                                             # (out, P)
    out_ref[0] = out.astype(out_ref.dtype)


# ---------------------------------------------------------------------------
# Wrapper: NCHW in / NCHW out, zero transposes (pure reshapes only).
# ---------------------------------------------------------------------------
@jax.jit
def sagate_forward(sar, opt, params):
    b, c, h, w = sar.shape                  # NCHW, like the PyTorch module
    p = h * w
    sar_f = sar.reshape(b, c, p)            # NCHW -> (B, C, P): pure reshape
    opt_f = opt.reshape(b, c, p)

    w1 = params["w1"]                       # (C, 2C)     fusion1.weight (out, in)
    b1 = params["b1"].reshape(c, 1)         # (C, 1)
    wg1_t = params["wg1"].T                 # (C, mid)    one-time tiny host prep
    wg2 = params["wg2"]                     # (2C, mid)
    w2 = params["w2"]                       # (out_ch, 2C)
    out_ch = w2.shape[0]
    b2 = params["b2"].reshape(out_ch, 1)    # (out_ch, 1)
    mid = wg2.shape[1]

    flops = b * p * (2 * c * 2 * c + 2 * out_ch * 2 * c) + b * 6 * c * mid
    bytes_accessed = 4 * (2 * b * c * p + b * out_ch * p
                          + w1.size + wg1_t.size + wg2.size + w2.size
                          + b1.size + b2.size)
    cost = pl.CostEstimate(flops=flops, transcendentals=2 * b * c,
                           bytes_accessed=bytes_accessed)

    out = pl.pallas_call(
        _sagate_fused_kernel,
        out_shape=jax.ShapeDtypeStruct((b, out_ch, p), jnp.float32),
        grid=(b,),
        in_specs=[
            pl.BlockSpec((1, c, p), lambda i: (i, 0, 0)),        # sar
            pl.BlockSpec((1, c, p), lambda i: (i, 0, 0)),        # opt
            pl.BlockSpec((c, 2 * c), lambda i: (0, 0)),          # w1  (grid-invariant)
            pl.BlockSpec((c, 1), lambda i: (0, 0)),              # b1
            pl.BlockSpec((c, mid), lambda i: (0, 0)),            # wg1^T
            pl.BlockSpec((2 * c, mid), lambda i: (0, 0)),        # wg2
            pl.BlockSpec((out_ch, 2 * c), lambda i: (0, 0)),     # w2
            pl.BlockSpec((out_ch, 1), lambda i: (0, 0)),         # b2
        ],
        out_specs=pl.BlockSpec((1, out_ch, p), lambda i: (i, 0, 0)),
        compiler_params=pltpu.CompilerParams(
            dimension_semantics=("parallel",),
            vmem_limit_bytes=64 * 1024 * 1024),
        cost_estimate=cost,
    )(sar_f, opt_f, w1, b1, wg1_t, wg2, w2, b2)

    return out.reshape(b, out_ch, h, w)     # (B, out, P) -> NCHW: pure reshape


# ---------------------------------------------------------------------------
# Pure-JAX reference (mirrors the PyTorch forward exactly)
# ---------------------------------------------------------------------------
def sagate_reference(sar, opt, params):
    b, c, h, w = sar.shape
    x = jnp.concatenate([sar, opt], axis=1)                        # (b, 2c, h, w)
    fea_u = (jnp.einsum("oi,bihw->bohw", params["w1"], x)
             + params["b1"].reshape(1, c, 1, 1))
    fea_s = jnp.mean(fea_u, axis=(2, 3)) + jnp.max(fea_u, axis=(2, 3))   # (b, c)
    hidden = jnp.maximum(jnp.einsum("mc,bc->bm", params["wg1"], fea_s), 0.0)
    logits = jnp.einsum("om,bm->bo", params["wg2"], hidden)        # (b, 2c)
    att = jax.nn.softmax(logits.reshape(b, 2, c), axis=1)
    a0 = att[:, 0].reshape(b, c, 1, 1)
    a1 = att[:, 1].reshape(b, c, 1, 1)
    vcat = jnp.concatenate([sar * a0, opt * a1], axis=1)           # (b, 2c, h, w)
    out_ch = params["w2"].shape[0]
    return (jnp.einsum("oi,bihw->bohw", params["w2"], vcat)
            + params["b2"].reshape(1, out_ch, 1, 1))


# ---------------------------------------------------------------------------
# Parameters stored in PyTorch conv orientation: weight = (out_ch, in_ch).
# ---------------------------------------------------------------------------
def make_params(key, channels, out_ch, reduction=16):
    mid = channels // reduction
    ks = jax.random.split(key, 6)
    s = 0.1
    return {
        # fusion1: Conv2d(2c, c, 1)
        "w1":  s * jax.random.normal(ks[0], (channels, 2 * channels), jnp.float32),
        "b1":  s * jax.random.normal(ks[1], (channels,), jnp.float32),
        # gate: Conv2d(c, c//r, 1, bias=False), Conv2d(c//r, 2c, 1, bias=False)
        "wg1": s * jax.random.normal(ks[2], (mid, channels), jnp.float32),
        "wg2": s * jax.random.normal(ks[3], (2 * channels, mid), jnp.float32),
        # fusion2: Conv2d(2c, out_ch, 1)
        "w2":  s * jax.random.normal(ks[4], (out_ch, 2 * channels), jnp.float32),
        "b2":  s * jax.random.normal(ks[5], (out_ch,), jnp.float32),
    }


if __name__ == "__main__":
    B, C, H, W = 2, 64, 16, 16
    OUT_CH, REDUCTION = 32, 16

    key = jax.random.PRNGKey(0)
    k_sar, k_opt, k_par = jax.random.split(key, 3)
    sar = jax.random.normal(k_sar, (B, C, H, W), jnp.float32)
    opt = jax.random.normal(k_opt, (B, C, H, W), jnp.float32)
    params = make_params(k_par, C, OUT_CH, REDUCTION)

    out = jax.block_until_ready(sagate_forward(sar, opt, params))
    ref = sagate_reference(sar, opt, params)

    assert out.shape == (B, OUT_CH, H, W)
    err = float(jnp.max(jnp.abs(out - ref)))
    assert jnp.allclose(out, ref, rtol=1e-4, atol=1e-4), f"mismatch vs reference, max abs err {err}"

    print("KERNEL_OK")
</pallas_src>

<mosaic_0001>
module attributes {stable_mosaic.version = 11 : i64} {
  func.func @_sagate_fused_kernel(%arg0: i32, %arg1: memref<1x64x256xf32, #tpu.memory_space<vmem>>, %arg2: memref<1x64x256xf32, #tpu.memory_space<vmem>>, %arg3: memref<64x128xf32, #tpu.memory_space<vmem>>, %arg4: memref<64x1xf32, #tpu.memory_space<vmem>>, %arg5: memref<64x4xf32, #tpu.memory_space<vmem>>, %arg6: memref<128x4xf32, #tpu.memory_space<vmem>>, %arg7: memref<32x128xf32, #tpu.memory_space<vmem>>, %arg8: memref<32x1xf32, #tpu.memory_space<vmem>>, %arg9: memref<1x32x256xf32, #tpu.memory_space<vmem>>) attributes {dimension_semantics = [#tpu.dimension_semantics<parallel>], iteration_bounds = array<i64: 2>, scalar_prefetch = 0 : i64, scratch_operands = 0 : i64, tpu.core_type = #tpu.core_type<tc>, window_params = [{transform_indices = @transform_0, window_bounds = array<i64: 1, 64, 256>}, {transform_indices = @transform_1, window_bounds = array<i64: 1, 64, 256>}, {pipeline_mode = #tpu.pipeline_mode<synchronous>, transform_indices = @transform_2, window_bounds = array<i64: 64, 128>}, {pipeline_mode = #tpu.pipeline_mode<synchronous>, transform_indices = @transform_3, window_bounds = array<i64: 64, 1>}, {pipeline_mode = #tpu.pipeline_mode<synchronous>, transform_indices = @transform_4, window_bounds = array<i64: 64, 4>}, {pipeline_mode = #tpu.pipeline_mode<synchronous>, transform_indices = @transform_5, window_bounds = array<i64: 128, 4>}, {pipeline_mode = #tpu.pipeline_mode<synchronous>, transform_indices = @transform_6, window_bounds = array<i64: 32, 128>}, {pipeline_mode = #tpu.pipeline_mode<synchronous>, transform_indices = @transform_7, window_bounds = array<i64: 32, 1>}, {transform_indices = @transform_8, window_bounds = array<i64: 1, 32, 256>}]} {
    %c0 = arith.constant 0 : index
    %c0_0 = arith.constant 0 : index
    %c0_1 = arith.constant 0 : index
    %0 = vector.load %arg1[%c0, %c0_0, %c0_1] : memref<1x64x256xf32, #tpu.memory_space<vmem>>, vector<1x64x256xf32>
    %1 = vector.shape_cast %0 : vector<1x64x256xf32> to vector<64x256xf32>
    %c0_2 = arith.constant 0 : index
    %c0_3 = arith.constant 0 : index
    %c0_4 = arith.constant 0 : index
    %2 = vector.load %arg2[%c0_2, %c0_3, %c0_4] : memref<1x64x256xf32, #tpu.memory_space<vmem>>, vector<1x64x256xf32>
    %3 = vector.shape_cast %2 : vector<1x64x256xf32> to vector<64x256xf32>
    %4 = tpu.concatenate %1, %3 in 0 : vector<64x256xf32>, vector<64x256xf32> -> vector<128x256xf32>
    %c0_5 = arith.constant 0 : index
    %c0_6 = arith.constant 0 : index
    %5 = vector.load %arg3[%c0_5, %c0_6] : memref<64x128xf32, #tpu.memory_space<vmem>>, vector<64x128xf32>
    %cst = arith.constant dense<0.000000e+00> : vector<64x256xf32>
    %6 = tpu.matmul %5, %4, %cst {dimension_numbers = #tpu.dot_dimension_numbers<[1], [0], [0], [1], [0, 0, 1, 1], [], []>} : vector<64x128xf32>, vector<128x256xf32>, vector<64x256xf32> -> vector<64x256xf32>
    %cst_7 = arith.constant dense<0.000000e+00> : vector<64xf32>
    %7 = vector.multi_reduction <add>, %6, %cst_7 [1] : vector<64x256xf32> to vector<64xf32>
    %8 = vector.shape_cast %7 : vector<64xf32> to vector<64x1xf32>
    %cst_8 = arith.constant 2.560000e+02 : f32
    %9 = vector.broadcast %cst_8 : f32 to vector<64x1xf32>
    %10 = arith.divf %8, %9 : vector<64x1xf32>
    %cst_9 = arith.constant dense<0xFF800000> : vector<64xf32>
    %11 = vector.multi_reduction <maximumf>, %6, %cst_9 [1] : vector<64x256xf32> to vector<64xf32>
    %12 = vector.shape_cast %11 : vector<64xf32> to vector<64x1xf32>
    %13 = arith.addf %10, %12 : vector<64x1xf32>
    %c0_10 = arith.constant 0 : index
    %c0_11 = arith.constant 0 : index
    %14 = vector.load %arg4[%c0_10, %c0_11] : memref<64x1xf32, #tpu.memory_space<vmem>>, vector<64x1xf32>
    %cst_12 = arith.constant 2.000000e+00 : f32
    %15 = vector.broadcast %cst_12 : f32 to vector<64x1xf32>
    %16 = arith.mulf %15, %14 : vector<64x1xf32>
    %17 = arith.addf %13, %16 : vector<64x1xf32>
    %c0_13 = arith.constant 0 : index
    %c0_14 = arith.constant 0 : index
    %18 = vector.load %arg5[%c0_13, %c0_14] : memref<64x4xf32, #tpu.memory_space<vmem>>, vector<64x4xf32>
    %19 = vector.broadcast %17 : vector<64x1xf32> to vector<64x4xf32>
    %20 = arith.mulf %18, %19 : vector<64x4xf32>
    %cst_15 = arith.constant dense<0.000000e+00> : vector<4xf32>
    %21 = vector.multi_reduction <add>, %20, %cst_15 [0] : vector<64x4xf32> to vector<4xf32>
    %22 = vector.shape_cast %21 : vector<4xf32> to vector<1x4xf32>
    %cst_16 = arith.constant 0.000000e+00 : f32
    %23 = vector.broadcast %cst_16 : f32 to vector<1x4xf32>
    %24 = arith.maximumf %22, %23 : vector<1x4xf32>
    %c0_17 = arith.constant 0 : index
    %c0_18 = arith.constant 0 : index
    %25 = vector.load %arg6[%c0_17, %c0_18] : memref<128x4xf32, #tpu.memory_space<vmem>>, vector<128x4xf32>
    %26 = vector.broadcast %24 : vector<1x4xf32> to vector<128x4xf32>
    %27 = arith.mulf %25, %26 : vector<128x4xf32>
    %cst_19 = arith.constant dense<0.000000e+00> : vector<128xf32>
    %28 = vector.multi_reduction <add>, %27, %cst_19 [1] : vector<128x4xf32> to vector<128xf32>
    %29 = vector.shape_cast %28 : vector<128xf32> to vector<128x1xf32>
    %30 = vector.extract_strided_slice %29 {offsets = [0, 0], sizes = [64, 1], strides = [1, 1]} : vector<128x1xf32> to vector<64x1xf32>
    %31 = vector.extract_strided_slice %29 {offsets = [64, 0], sizes = [64, 1], strides = [1, 1]} : vector<128x1xf32> to vector<64x1xf32>
    %32 = arith.maximumf %30, %31 : vector<64x1xf32>
    %33 = arith.subf %30, %32 : vector<64x1xf32>
    %34 = math.exp %33 : vector<64x1xf32>
    %35 = arith.subf %31, %32 : vector<64x1xf32>
    %36 = math.exp %35 : vector<64x1xf32>
    %37 = arith.addf %34, %36 : vector<64x1xf32>
    %38 = arith.divf %34, %37 : vector<64x1xf32>
    %39 = arith.divf %36, %37 : vector<64x1xf32>
    %40 = vector.broadcast %38 : vector<64x1xf32> to vector<64x256xf32>
    %41 = arith.mulf %1, %40 : vector<64x256xf32>
    %42 = vector.broadcast %39 : vector<64x1xf32> to vector<64x256xf32>
    %43 = arith.mulf %3, %42 : vector<64x256xf32>
    %44 = tpu.concatenate %41, %43 in 0 : vector<64x256xf32>, vector<64x256xf32> -> vector<128x256xf32>
    %c0_20 = arith.constant 0 : index
    %c0_21 = arith.constant 0 : index
    %45 = vector.load %arg7[%c0_20, %c0_21] : memref<32x128xf32, #tpu.memory_space<vmem>>, vector<32x128xf32>
    %cst_22 = arith.constant dense<0.000000e+00> : vector<32x256xf32>
    %46 = tpu.matmul %45, %44, %cst_22 {dimension_numbers = #tpu.dot_dimension_numbers<[1], [0], [0], [1], [0, 0, 1, 1], [], []>} : vector<32x128xf32>, vector<128x256xf32>, vector<32x256xf32> -> vector<32x256xf32>
    %c0_23 = arith.constant 0 : index
    %c0_24 = arith.constant 0 : index
    %47 = vector.load %arg8[%c0_23, %c0_24] : memref<32x1xf32, #tpu.memory_space<vmem>>, vector<32x1xf32>
    %48 = vector.broadcast %47 : vector<32x1xf32> to vector<32x256xf32>
    %49 = arith.addf %46, %48 : vector<32x256xf32>
    %c0_25 = arith.constant 0 : index
    %c0_26 = arith.constant 0 : index
    %c0_27 = arith.constant 0 : index
    %50 = vector.load %arg9[%c0_25, %c0_26, %c0_27] : memref<1x32x256xf32, #tpu.memory_space<vmem>>, vector<1x32x256xf32>
    %51 = vector.shape_cast %50 : vector<1x32x256xf32> to vector<32x256xf32>
    %52 = vector.shape_cast %49 : vector<32x256xf32> to vector<1x32x256xf32>
    tpu.vector_store %arg9[%c0_25, %c0_26, %c0_27], %52 {strides = array<i32>} : memref<1x32x256xf32, #tpu.memory_space<vmem>>, vector<1x32x256xf32>,
    return
  }
  func.func @transform_0(%arg0: i32) -> (i32, i32, i32) {
    %c0_i32 = arith.constant 0 : i32
    %c0_i32_0 = arith.constant 0 : i32
    %c0_i32_1 = arith.constant 0 : i32
    return %arg0, %c0_i32, %c0_i32_0 : i32, i32, i32
  }
  func.func @transform_1(%arg0: i32) -> (i32, i32, i32) {
    %c0_i32 = arith.constant 0 : i32
    %c0_i32_0 = arith.constant 0 : i32
    %c0_i32_1 = arith.constant 0 : i32
    return %arg0, %c0_i32, %c0_i32_0 : i32, i32, i32
  }
  func.func @transform_2(%arg0: i32) -> (i32, i32) {
    %c0_i32 = arith.constant 0 : i32
    %c0_i32_0 = arith.constant 0 : i32
    %c0_i32_1 = arith.constant 0 : i32
    return %c0_i32, %c0_i32_0 : i32, i32
  }
  func.func @transform_3(%arg0: i32) -> (i32, i32) {
    %c0_i32 = arith.constant 0 : i32
    %c0_i32_0 = arith.constant 0 : i32
    %c0_i32_1 = arith.constant 0 : i32
    return %c0_i32, %c0_i32_0 : i32, i32
  }
  func.func @transform_4(%arg0: i32) -> (i32, i32) {
    %c0_i32 = arith.constant 0 : i32
    %c0_i32_0 = arith.constant 0 : i32
    %c0_i32_1 = arith.constant 0 : i32
    return %c0_i32, %c0_i32_0 : i32, i32
  }
  func.func @transform_5(%arg0: i32) -> (i32, i32) {
    %c0_i32 = arith.constant 0 : i32
    %c0_i32_0 = arith.constant 0 : i32
    %c0_i32_1 = arith.constant 0 : i32
    return %c0_i32, %c0_i32_0 : i32, i32
  }
  func.func @transform_6(%arg0: i32) -> (i32, i32) {
    %c0_i32 = arith.constant 0 : i32
    %c0_i32_0 = arith.constant 0 : i32
    %c0_i32_1 = arith.constant 0 : i32
    return %c0_i32, %c0_i32_0 : i32, i32
  }
  func.func @transform_7(%arg0: i32) -> (i32, i32) {
    %c0_i32 = arith.constant 0 : i32
    %c0_i32_0 = arith.constant 0 : i32
    %c0_i32_1 = arith.constant 0 : i32
    return %c0_i32, %c0_i32_0 : i32, i32
  }
  func.func @transform_8(%arg0: i32) -> (i32, i32, i32) {
    %c0_i32 = arith.constant 0 : i32
    %c0_i32_0 = arith.constant 0 : i32
    %c0_i32_1 = arith.constant 0 : i32
    return %arg0, %c0_i32, %c0_i32_0 : i32, i32, i32
  }
}

</mosaic_0001>

<bundles_post_ra>
// kernel: sagate_forward.1
= control target key start
LH: loop header
LB: loop body
LE: loop exit
PB: predicated region body
PF: predicated region fallthrough
CT: control target
= control target key end

     0   :  { %s1170_s27 = smov 0   ;;  %s1552_s0 = inlined_call_operand.vmem [shape: f32[2,64,256], index: 0, kind: input, shape index: {}]   ;;  %s1553_s1 = inlined_call_operand.vmem [shape: f32[2,64,256], index: 1, kind: input, shape index: {}]   ;;  %s1554_s2 = inlined_call_operand.vmem [shape: f32[64,128], index: 2, kind: input, shape index: {}]   ;;  %s1555_s3 = inlined_call_operand.vmem [shape: f32[64,1], index: 3, kind: input, shape index: {}]   ;;  %s1556_s4 = inlined_call_operand.vmem [shape: f32[64,4], index: 4, kind: input, shape index: {}]   ;;  %s1557_s5 = inlined_call_operand.vmem [shape: f32[128,4], index: 5, kind: input, shape index: {}]   ;;  %s1558_s6 = inlined_call_operand.vmem [shape: f32[32,128], index: 6, kind: input, shape index: {}]   ;;  %s1559_s7 = inlined_call_operand.vmem [shape: f32[32,1], index: 7, kind: input, shape index: {}]   ;;  %s1560_s8 = inlined_call_operand.vmem [shape: f32[2,32,256], index: 8, kind: output, shape index: {}]  }
   0x1 LB: > { %s1039_s28 = sadd.s32 4294967295, %s1121_s27   ;;  %p1043_p0 = scmp.ge.s32.totalorder %s1121_s27, 1  ;;  %s1121_s27 = sphi %s1170_s27, %s18_s27  }
   0x2   : > { %p272_p1 = scmp.lt.s32.totalorder %s1121_s27, 3 }
   0x4   : > { %p273_p2 = pnand %p1043_p0, %p272_p1 }
   0x5   : > { %p311_p3 = scmp.lt.s32.totalorder (!%p273_p2), %s1039_s28, 1 }
   0x6   : > { %276 = sbr.rel (%p273_p2) target bundleno = 1001 (0x3e9), region = 52 }
   0xb   : > { %v1123_v0 = vmov 0.0   ;;  %s1562_s28 = smov (!%p311_p3, %s1039_s28), 1  ;;  %v358_v33 = vld [vmem:[%s1554_s2] sm:$0xff]  ;;  %v359_v34 = vld [vmem:[%s1554_s2 + $0x8] sm:$0xff]  ;;  %v360_v35 = vld [vmem:[%s1554_s2 + $0x10] sm:$0xff]  ;;  %v1124_v61 = vmov 0  }
   0xc   : > { %430 = vmatprep.mubr.f32.mxu0 %v1123_v0  ;;  %939 = vmatprep.mubr.f32.mxu1 %v1123_v0  ;;  %s1052_s29 = sshll.u32 %s1562_s28, 7  ;;  %v361_v36 = vld [vmem:[%s1554_s2 + $0x18] sm:$0xff]  ;;  %v362_v37 = vld [vmem:[%s1554_s2 + $0x20] sm:$0xff]  ;;  %v363_v38 = vld [vmem:[%s1554_s2 + $0x28] sm:$0xff]  ;;  %vm624_vm0 = vcmask 31744  }
   0xd   : > { %s320_s10 = scalar_lea.vmem %s1553_s1, %s1052_s29  ;;  %s1228_s13 = scalar_lea.vmem %s1552_s0, %s1052_s29  ;;  %v364_v39 = vld [vmem:[%s1554_s2 + $0x30] sm:$0xff]  ;;  %v365_v40 = vld [vmem:[%s1554_s2 + $0x38] sm:$0xff]  ;;  %1065 = vset.pattern.permute.xlu0 %v1124_v61  ;;  %1066 = vset.pattern.permute.xlu1 %v1124_v61 }
   0xe   : > { %v1186_v1 = vld [vmem:[%s320_s10 + $0x78] sm:$0xff]  ;;  %v1188_v2 = vld [vmem:[%s320_s10 + $0x70] sm:$0xff]  ;;  %v1190_v3 = vld [vmem:[%s320_s10 + $0x68] sm:$0xff] }
   0xf   : > { %366 = vmatprep.subr.mxu0 %v1186_v1  ;;  %v1193_v4 = vld [vmem:[%s320_s10 + $0x60] sm:$0xff]  ;;  %v1196_v5 = vld [vmem:[%s320_s10 + $0x58] sm:$0xff]  ;;  %v1199_v6 = vld [vmem:[%s320_s10 + $0x50] sm:$0xff] }
  0x10   : > { %367 = vmatpush1.msra.mxu0 %v1188_v2  ;;  %v1202_v7 = vld [vmem:[%s320_s10 + $0x48] sm:$0xff]  ;;  %v1205_v8 = vld [vmem:[%s320_s10 + $0x40] sm:$0xff]  ;;  %v1208_v9 = vld [vmem:[%s320_s10 + $0x38] sm:$0xff] }
  0x11   : > { %368 = vmatprep.subr.mxu0 %v1190_v3  ;;  %v1211_v10 = vld [vmem:[%s320_s10 + $0x30] sm:$0xff]  ;;  %v1214_v11 = vld [vmem:[%s320_s10 + $0x28] sm:$0xff]  ;;  %v1217_v12 = vld [vmem:[%s320_s10 + $0x20] sm:$0xff] }
  0x12   : > { %369 = vmatpush1.msra.mxu0 %v1193_v4  ;;  %v1220_v13 = vld [vmem:[%s320_s10 + $0x18] sm:$0xff]  ;;  %v1223_v14 = vld [vmem:[%s320_s10 + $0x10] sm:$0xff]  ;;  %v1231_v15 = vld [vmem:[%s320_s10 + $0x8] sm:$0xff] }
  0x13   : > { %370 = vmatprep.subr.mxu0 %v1196_v5  ;;  %v1234_v16 = vld [vmem:[%s320_s10] sm:$0xff]  ;;  %v1238_v17 = vld [vmem:[%s1228_s13 + $0x78] sm:$0xff]  ;;  %v1242_v18 = vld [vmem:[%s1228_s13 + $0x70] sm:$0xff]  ;;  %s1054_s10 = sshll.u32 %s1562_s28, 6 }
  0x14   : > { %371 = vmatpush1.msra.mxu0 %v1199_v6  ;;  %v1246_v19 = vld [vmem:[%s1228_s13 + $0x68] sm:$0xff]  ;;  %v1250_v20 = vld [vmem:[%s1228_s13 + $0x60] sm:$0xff]  ;;  %v1254_v21 = vld [vmem:[%s1228_s13 + $0x58] sm:$0xff] }
  0x15   : > { %372 = vmatprep.subr.mxu0 %v1202_v7  ;;  %v1258_v22 = vld [vmem:[%s1228_s13 + $0x50] sm:$0xff]  ;;  %v1262_v23 = vld [vmem:[%s1228_s13 + $0x48] sm:$0xff]  ;;  %v1266_v24 = vld [vmem:[%s1228_s13 + $0x40] sm:$0xff] }
  0x16   : > { %373 = vmatpush1.msra.mxu0 %v1205_v8  ;;  %v1270_v25 = vld [vmem:[%s1228_s13 + $0x38] sm:$0xff]  ;;  %v1274_v26 = vld [vmem:[%s1228_s13 + $0x30] sm:$0xff]  ;;  %v1278_v27 = vld [vmem:[%s1228_s13 + $0x28] sm:$0xff] }
  0x17   : > { %374 = vmatprep.subr.mxu0 %v1208_v9  ;;  %v1282_v28 = vld [vmem:[%s1228_s13 + $0x20] sm:$0xff]  ;;  %v1286_v29 = vld [vmem:[%s1228_s13 + $0x18] sm:$0xff]  ;;  %v1290_v30 = vld [vmem:[%s1228_s13 + $0x10] sm:$0xff] }
  0x18   : > { %375 = vmatpush1.msra.mxu0 %v1211_v10  ;;  %v1294_v31 = vld [vmem:[%s1228_s13 + $0x8] sm:$0xff]  ;;  %v1298_v32 = vld [vmem:[%s1228_s13] sm:$0xff]  ;;  %s325_s13 = scalar_lea.vmem %s1560_s8, %s1054_s10 }
  0x19   : > { %376 = vmatprep.subr.mxu0 %v1214_v11 }
  0x1a   : > { %377 = vmatpush1.msra.mxu0 %v1217_v12 }
  0x1b   : > { %378 = vmatprep.subr.mxu0 %v1220_v13 }
  0x1c   : > { %379 = vmatpush1.msra.mxu0 %v1223_v14 }
  0x1d   : > { %380 = vmatprep.subr.mxu0 %v1231_v15 }
  0x1e   : > { %381 = vmatpush1.msra.mxu0 %v1234_v16 }
  0x1f   : > { %382 = vmatprep.subr.mxu0 %v1238_v17 }
  0x20   : > { %383 = vmatpush1.msra.mxu0 %v1242_v18 }
  0x21   : > { %384 = vmatprep.subr.mxu0 %v1246_v19 }
  0x22   : > { %385 = vmatpush1.msra.mxu0 %v1250_v20 }
  0x23   : > { %386 = vmatprep.subr.mxu0 %v1254_v21 }
  0x24   : > { %387 = vmatpush1.msra.mxu0 %v1258_v22 }
  0x25   : > { %388 = vmatprep.subr.mxu0 %v1262_v23 }
  0x26   : > { %389 = vmatpush1.msra.mxu0 %v1266_v24 }
  0x27   : > { %390 = vmatprep.subr.mxu0 %v1270_v25 }
  0x28   : > { %391 = vmatpush1.msra.mxu0 %v1274_v26 }
  0x29   : > { %392 = vmatprep.subr.mxu0 %v1278_v27 }
  0x2a   : > { %393 = vmatpush1.msra.mxu0 %v1282_v28 }
  0x2b   : > { %394 = vmatprep.subr.mxu0 %v1286_v29 }
  0x2c   : > { %395 = vmatpush1.msra.mxu0 %v1290_v30 }
  0x2d   : > { %396 = vmatprep.subr.mxu0 %v1294_v31 }
  0x2e   : > { %397 = vmatpush1.msra.mxu0 %v1298_v32 }
  0x2f   : > { %431 = vmatmul.mubr.f32.vlgmr.msra.gmra.mxu0 %v358_v33 }
  0x30   : > { %436 = vmatprep.mubr.f32.mxu0 %v1123_v0 }
  0x33   : > { %437 = vmatmul.mubr.f32.gmra.mxu0 %v359_v34 }
  0x34   : > { %442 = vmatprep.mubr.f32.mxu0 %v1123_v0 }
  0x37   : > { %443 = vmatmul.mubr.f32.gmra.mxu0 %v360_v35 }
  0x38   : > { %448 = vmatprep.mubr.f32.mxu0 %v1123_v0 }
  0x3b   : > { %449 = vmatmul.mubr.f32.gmra.mxu0 %v361_v36 }
  0x3c   : > { %454 = vmatprep.mubr.f32.mxu0 %v1123_v0 }
  0x3f   : > { %455 = vmatmul.mubr.f32.gmra.mxu0 %v362_v37 }
  0x40   : > { %460 = vmatprep.mubr.f32.mxu0 %v1123_v0 }
  0x43   : > { %461 = vmatmul.mubr.f32.gmra.mxu0 %v363_v38 }
  0x44   : > { %466 = vmatprep.mubr.f32.mxu0 %v1123_v0 }
  0x47   : > { %467 = vmatmul.mubr.f32.gmra.mxu0 %v364_v39 }
  0x48   : > { %472 = vmatprep.mubr.f32.mxu0 %v1123_v0 }
  0x4b   : > { %473 = vmatmul.mubr.f32.gmra.mxu0 %v365_v40 }
  0xef   : > { %v432_v41 = vpop.f32.mrf.mxu0 }
  0xf1   : > { %v434_v42 = vpop.f32.mrf.mxu0 }
  0xf2   : > { %v512_v43 = vmax.f32 %v432_v41, %v434_v42  ;;  %v479_v44 = vadd.f32 %v434_v42, %v432_v41 }
  0xf3   : > { %v438_v45 = vpop.f32.mrf.mxu0 }
  0xf4   : > { %513 = vmax.xlane.f32.xlu1 %v512_v43  ;;  %480 = vadd.xlane.f32.xlu0 %v479_v44  ;;  %v544_v43 = vld [vmem:[%s1555_s3] sm:$0xff] }
  0xf5   : > { %v440_v46 = vpop.f32.mrf.mxu0 }
  0xf6   : > { %v482_v47 = vadd.f32 %v440_v46, %v438_v45  ;;  %v515_v50 = vmax.f32 %v438_v45, %v440_v46  ;;  %v552_v46 = vmul.f32 2.0, %v544_v43 }
  0xf7   : > { %v444_v48 = vpop.f32.mrf.mxu0 }
  0xf8   : > { %483 = vadd.xlane.f32.xlu0 %v482_v47 }
  0xf9   : > { %v446_v49 = vpop.f32.mrf.mxu0 }
  0xfa   : > { %v485_v51 = vadd.f32 %v446_v49, %v444_v48  ;;  %v518_v54 = vmax.f32 %v444_v48, %v446_v49 }
  0xfb   : > { %v450_v52 = vpop.f32.mrf.mxu0 }
  0xfc   : > { %516 = vmax.xlane.f32.xlu0 %v515_v50  ;;  %486 = vadd.xlane.f32.xlu1 %v485_v51  ;;  %v545_v50 = vld [vmem:[%s1555_s3 + $0x8] sm:$0xff] }
  0xfd   : > { %v452_v53 = vpop.f32.mrf.mxu0 }
  0xfe   : > { %v488_v55 = vadd.f32 %v452_v53, %v450_v52  ;;  %v521_v58 = vmax.f32 %v450_v52, %v452_v53  ;;  %v553_v53 = vmul.f32 2.0, %v545_v50 }
  0xff   : > { %v456_v56 = vpop.f32.mrf.mxu0 }
 0x100   : > { %519 = vmax.xlane.f32.xlu0 %v518_v54  ;;  %489 = vadd.xlane.f32.xlu1 %v488_v55 }
 0x101   : > { %v458_v57 = vpop.f32.mrf.mxu0 }
 0x102   : > { %v491_v59 = vadd.f32 %v458_v57, %v456_v56  ;;  %v524_v63 = vmax.f32 %v456_v56, %v458_v57  ;;  %v546_v56 = vld [vmem:[%s1555_s3 + $0x10] sm:$0xff] }
 0x103   : > { %v462_v60 = vpop.f32.mrf.mxu0 }
 0x104   : > { %522 = vmax.xlane.f32.xlu0 %v521_v58  ;;  %492 = vadd.xlane.f32.xlu1 %v491_v59 }
 0x105   : > { %v464_v62 = vpop.f32.mrf.mxu0 }
 0x106   : > { %v494_v33 = vadd.f32 %v464_v62, %v462_v60  ;;  %v527_v36 = vmax.f32 %v462_v60, %v464_v62  ;;  %v554_v60 = vmul.f32 2.0, %v546_v56 }
 0x107   : > { %v468_v34 = vpop.f32.mrf.mxu0 }
 0x108   : > { %525 = vmax.xlane.f32.xlu0 %v524_v63  ;;  %495 = vadd.xlane.f32.xlu1 %v494_v33  ;;  %v547_v63 = vld [vmem:[%s1555_s3 + $0x18] sm:$0xff] }
 0x109   : > { %v470_v35 = vpop.f32.mrf.mxu0 }
 0x10a   : > { %v497_v37 = vadd.f32 %v470_v35, %v468_v34  ;;  %v530_v41 = vmax.f32 %v468_v34, %v470_v35 }
 0x10b   : > { %v474_v38 = vpop.f32.mrf.mxu0 }
 0x10c   : > { %528 = vmax.xlane.f32.xlu0 %v527_v36  ;;  %498 = vadd.xlane.f32.xlu1 %v497_v37  ;;  %v555_v36 = vmul.f32 2.0, %v547_v63 }
 0x10d   : > { %v476_v39 = vpop.f32.mrf.mxu0 }
 0x10e   : > { %v500_v40 = vadd.f32 %v476_v39, %v474_v38  ;;  %v533_v42 = vmax.f32 %v474_v38, %v476_v39  ;;  %v548_v39 = vld [vmem:[%s1555_s3 + $0x20] sm:$0xff] }
 0x10f   : > { %v556_v43 = vmul.f32 2.0, %v548_v39  ;;  %v569_v39 = vld [vmem:[%s1556_s4 + $0x8] sm:$0xff] }
 0x110   : > { %531 = vmax.xlane.f32.xlu0 %v530_v41  ;;  %501 = vadd.xlane.f32.xlu1 %v500_v40 }
 0x114   : > { %534 = vmax.xlane.f32.xlu1 %v533_v42 }
 0x17d   : > { %v481_v44 = vpop.xlane.xlu0 %480  ;;  %v514_v47 = vpop.xlane.xlu1 %513 }
 0x17e   : > { %v504_v45 = vmul.f32 0.00390625, %v481_v44 }
 0x180   : > { %v536_v48 = vadd.f32 %v514_v47, %v504_v45 }
 0x181   : > { %v484_v49 = vpop.xlane.xlu0 %483 }
 0x182   : > { %v560_v51 = vadd.f32 %v552_v46, %v536_v48  ;;  %v505_v52 = vmul.f32 0.00390625, %v484_v49  ;;  %v549_v46 = vld [vmem:[%s1555_s3 + $0x28] sm:$0xff] }
 0x183   : > { %v557_v50 = vmul.f32 2.0, %v549_v46 }
 0x184   : > { %578 = vperm.xlu0 %1065, %v560_v51  }
 0x185   : > { %v517_v54 = vpop.xlane.xlu0 %516  ;;  %v487_v55 = vpop.xlane.xlu1 %486 }
 0x186   : > { %v537_v57 = vadd.f32 %v517_v54, %v505_v52  ;;  %v506_v59 = vmul.f32 0.00390625, %v487_v55 }
 0x188   : > { %v561_v58 = vadd.f32 %v553_v53, %v537_v57  ;;  %v550_v53 = vld [vmem:[%s1555_s3 + $0x30] sm:$0xff] }
 0x189   : > { %v520_v61 = vpop.xlane.xlu0 %519  ;;  %v490_v62 = vpop.xlane.xlu1 %489  ;;  %v558_v57 = vmul.f32 2.0, %v550_v53 }
 0x18a   : > { %v538_v33 = vadd.f32 %v520_v61, %v506_v59  ;;  %583 = vperm.xlu1 %1066, %v561_v58   ;;  %v507_v35 = vmul.f32 0.00390625, %v490_v62 }
 0x18c   : > { %v562_v34 = vadd.f32 %v554_v60, %v538_v33  ;;  %v551_v60 = vld [vmem:[%s1555_s3 + $0x38] sm:$0xff] }
 0x18d   : > { %v523_v37 = vpop.xlane.xlu0 %522  ;;  %v493_v38 = vpop.xlane.xlu1 %492  ;;  %v559_v33 = vmul.f32 2.0, %v551_v60 }
 0x18e   : > { %v539_v40 = vadd.f32 %v523_v37, %v507_v35  ;;  %588 = vperm.xlu1 %1066, %v562_v34   ;;  %v508_v42 = vmul.f32 0.00390625, %v493_v38 }
 0x190   : > { %v563_v41 = vadd.f32 %v555_v36, %v539_v40  ;;  %v568_v40 = vld [vmem:[%s1556_s4] sm:$0xff] }
 0x191   : > { %v526_v44 = vpop.xlane.xlu0 %525  ;;  %v496_v45 = vpop.xlane.xlu1 %495 }
 0x192   : > { %v540_v47 = vadd.f32 %v526_v44, %v508_v42  ;;  %593 = vperm.xlu1 %1066, %v563_v41   ;;  %v509_v49 = vmul.f32 0.00390625, %v496_v45  ;;  %v570_v42 = vld [vmem:[%s1556_s4 + $0x10] sm:$0xff]  ;;  %v571_v45 = vld [vmem:[%s1556_s4 + $0x18] sm:$0xff] }
 0x194   : > { %v564_v48 = vadd.f32 %v556_v43, %v540_v47 }
 0x195   : > { %v529_v51 = vpop.xlane.xlu0 %528  ;;  %v499_v52 = vpop.xlane.xlu1 %498 }
 0x196   : > { %v541_v54 = vadd.f32 %v529_v51, %v509_v49  ;;  %598 = vperm.xlu1 %1066, %v564_v48   ;;  %v510_v56 = vmul.f32 0.00390625, %v499_v52  ;;  %v572_v48 = vld [vmem:[%s1556_s4 + $0x20] sm:$0xff]  ;;  %v573_v52 = vld [vmem:[%s1556_s4 + $0x28] sm:$0xff] }
 0x198   : > { %v565_v55 = vadd.f32 %v557_v50, %v541_v54 }
 0x199   : > { %v532_v58 = vpop.xlane.xlu0 %531  ;;  %v502_v59 = vpop.xlane.xlu1 %501 }
 0x19a   : > { %v542_v61 = vadd.f32 %v532_v58, %v510_v56  ;;  %603 = vperm.xlu1 %1066, %v565_v55   ;;  %v511_v63 = vmul.f32 0.00390625, %v502_v59 }
 0x19c   : > { %v566_v62 = vadd.f32 %v558_v57, %v542_v61  ;;  %v574_v61 = vld [vmem:[%s1556_s4 + $0x30] sm:$0xff] }
 0x19d   : > { %v535_v34 = vpop.xlane.xlu1 %534 }
 0x19e   : > { %v543_v35 = vadd.f32 %v535_v34, %v511_v63  ;;  %608 = vperm.xlu1 %1066, %v566_v62  }
 0x1a0   : > { %v567_v36 = vadd.f32 %v559_v33, %v543_v35 }
 0x1a2   : > { %613 = vperm.xlu1 %1066, %v567_v36  }
 0x1ff   : > { %v579_v41 = vpop.permute.xlu0 %578 }
 0x200   : > { %v616_v46 = vmul.f32 %v579_v41, %v568_v40 }
 0x202   : > { %v625_v53 = vsel %vm624_vm0, %v616_v46, 0.0 }
 0x205   : > { %v584_v37 = vpop.permute.xlu1 %583 }
 0x206   : > { %v617_v44 = vmul.f32 %v584_v37, %v569_v39  ;;  %v575_v37 = vld [vmem:[%s1556_s4 + $0x38] sm:$0xff] }
 0x208   : > { %v626_v50 = vsel %vm624_vm0, %v617_v44, 0.0 }
 0x209   : > { %v589_v38 = vpop.permute.xlu1 %588  ;;  %v627_v56 = vadd.f32 %v626_v50, %v625_v53 }
 0x20a   : > { %v618_v47 = vmul.f32 %v589_v38, %v570_v42 }
 0x20c   : > { %v628_v54 = vsel %vm624_vm0, %v618_v47, 0.0 }
 0x20d   : > { %v594_v43 = vpop.permute.xlu1 %593  ;;  %v629_v60 = vadd.f32 %v628_v54, %v627_v56  ;;  %v661_v54 = vld [vmem:[%s1557_s5 + $0x70] sm:$0xff] }
 0x20e   : > { %v619_v51 = vmul.f32 %v594_v43, %v571_v45 }
 0x210   : > { %v630_v58 = vsel %vm624_vm0, %v619_v51, 0.0  ;;  %v662_v51 = vld [vmem:[%s1557_s5 + $0x78] sm:$0xff] }
 0x211   : > { %v599_v49 = vpop.permute.xlu1 %598  ;;  %v631_v63 = vadd.f32 %v630_v58, %v629_v60 }
 0x212   : > { %v620_v55 = vmul.f32 %v599_v49, %v572_v48 }
 0x214   : > { %v632_v62 = vsel %vm624_vm0, %v620_v55, 0.0  ;;  %v653_v55 = vld [vmem:[%s1557_s5 + $0x30] sm:$0xff] }
 0x215   : > { %v604_v57 = vpop.permute.xlu1 %603  ;;  %v633_v36 = vadd.f32 %v632_v62, %v631_v63  ;;  %v660_v62 = vld [vmem:[%s1557_s5 + $0x68] sm:$0xff] }
 0x216   : > { %v621_v59 = vmul.f32 %v604_v57, %v573_v52  ;;  %v654_v52 = vld [vmem:[%s1557_s5 + $0x38] sm:$0xff]  ;;  %v652_v63 = vld [vmem:[%s1557_s5 + $0x28] sm:$0xff] }
 0x218   : > { %v634_v34 = vsel %vm624_vm0, %v621_v59, 0.0 }
 0x219   : > { %v609_v33 = vpop.permute.xlu1 %608  ;;  %v635_v39 = vadd.f32 %v634_v34, %v633_v36 }
 0x21a   : > { %v622_v35 = vmul.f32 %v609_v33, %v574_v61 }
 0x21c   : > { %v636_v38 = vsel %vm624_vm0, %v622_v35, 0.0 }
 0x21d   : > { %v614_v40 = vpop.permute.xlu1 %613  ;;  %v637_v42 = vadd.f32 %v636_v38, %v635_v39  ;;  %v651_v38 = vld [vmem:[%s1557_s5 + $0x20] sm:$0xff] }
 0x21e   : > { %v623_v41 = vmul.f32 %v614_v40, %v575_v37  ;;  %v659_v37 = vld [vmem:[%s1557_s5 + $0x60] sm:$0xff] }
 0x220   : > { %v638_v43 = vsel %vm624_vm0, %v623_v41, 0.0 }
 0x221   : > { %v639_v44 = vadd.f32 %v638_v43, %v637_v42  ;;  %v658_v43 = vld [vmem:[%s1557_s5 + $0x58] sm:$0xff] }
 0x223   : > { %v640_v45 = vrot.slane %v639_v44, 4 }
 0x225   : > { %v641_v46 = vadd.f32 %v640_v45, %v639_v44  ;;  %v650_v44 = vld [vmem:[%s1557_s5 + $0x18] sm:$0xff] }
 0x227   : > { %v642_v47 = vrot.slane %v641_v46, 2 }
 0x229   : > { %v643_v48 = vadd.f32 %v642_v47, %v641_v46 }
 0x22b   : > { %v644_v49 = vrot.slane %v643_v48, 1 }
 0x22d   : > { %v645_v50 = vadd.f32 %v644_v49, %v643_v48  ;;  %v657_v49 = vld [vmem:[%s1557_s5 + $0x50] sm:$0xff] }
 0x22f   : > { %v646_v53 = vmax.f32 %v645_v50, 0.0  ;;  %v649_v50 = vld [vmem:[%s1557_s5 + $0x10] sm:$0xff] }
 0x231   : > { %v678_v56 = vmul.f32 %v662_v51, %v646_v53  ;;  %v670_v57 = vmul.f32 %v654_v52, %v646_v53  ;;  %v677_v60 = vmul.f32 %v661_v54, %v646_v53  ;;  %v669_v61 = vmul.f32 %v653_v55, %v646_v53 }
 0x232   : > { %v676_v35 = vmul.f32 %v660_v62, %v646_v53  ;;  %v668_v36 = vmul.f32 %v652_v63, %v646_v53  ;;  %v675_v41 = vmul.f32 %v659_v37, %v646_v53  ;;  %v667_v42 = vmul.f32 %v651_v38, %v646_v53  ;;  %v655_v62 = vld [vmem:[%s1557_s5 + $0x40] sm:$0xff] }
 0x233   : > { %v724_v58 = vsel %vm624_vm0, %v678_v56, 0.0  ;;  %v700_v59 = vsel %vm624_vm0, %v670_v57, 0.0  ;;  %v721_v33 = vsel %vm624_vm0, %v677_v60, 0.0  ;;  %v697_v34 = vsel %vm624_vm0, %v669_v61, 0.0  ;;  %v656_v56 = vld [vmem:[%s1557_s5 + $0x48] sm:$0xff]  ;;  %v647_v63 = vld [vmem:[%s1557_s5] sm:$0xff] }
 0x234   : > { %725 = vadd.xlane.f32.xlu0 %v724_v58  ;;  %701 = vadd.xlane.f32.xlu1 %v700_v59  ;;  %v718_v39 = vsel %vm624_vm0, %v676_v35, 0.0  ;;  %v694_v40 = vsel %vm624_vm0, %v668_v36, 0.0  ;;  %v715_v45 = vsel %vm624_vm0, %v675_v41, 0.0  ;;  %v691_v46 = vsel %vm624_vm0, %v667_v42, 0.0  ;;  %v648_v57 = vld [vmem:[%s1557_s5 + $0x8] sm:$0xff]  ;;  %v854_v41 = vld [vmem:[%s1559_s7 + $0x18] sm:$0xff] }
 0x235   : > { %v674_v47 = vmul.f32 %v658_v43, %v646_v53  ;;  %v666_v48 = vmul.f32 %v650_v44, %v646_v53  ;;  %v673_v54 = vmul.f32 %v657_v49, %v646_v53  ;;  %v665_v55 = vmul.f32 %v649_v50, %v646_v53 }
 0x236   : > { %v672_v60 = vmul.f32 %v656_v56, %v646_v53  ;;  %v664_v61 = vmul.f32 %v648_v57, %v646_v53  ;;  %v671_v35 = vmul.f32 %v655_v62, %v646_v53  ;;  %v663_v36 = vmul.f32 %v647_v63, %v646_v53  ;;  %v851_v53 = vld [vmem:[%s1559_s7] sm:$0xff] }
 0x237   : > { %v712_v51 = vsel %vm624_vm0, %v674_v47, 0.0  ;;  %v688_v52 = vsel %vm624_vm0, %v666_v48, 0.0  ;;  %v709_v58 = vsel %vm624_vm0, %v673_v54, 0.0  ;;  %v685_v59 = vsel %vm624_vm0, %v665_v55, 0.0 }
 0x238   : > { %722 = vadd.xlane.f32.xlu1 %v721_v33  ;;  %698 = vadd.xlane.f32.xlu0 %v697_v34  ;;  %v706_v33 = vsel %vm624_vm0, %v672_v60, 0.0  ;;  %v682_v34 = vsel %vm624_vm0, %v664_v61, 0.0  ;;  %v703_v37 = vsel %vm624_vm0, %v671_v35, 0.0  ;;  %v679_v38 = vsel %vm624_vm0, %v663_v36, 0.0 }
 0x23c   : > { %719 = vadd.xlane.f32.xlu1 %v718_v39  ;;  %695 = vadd.xlane.f32.xlu0 %v694_v40  ;;  %v852_v39 = vld [vmem:[%s1559_s7 + $0x8] sm:$0xff]  ;;  %v853_v40 = vld [vmem:[%s1559_s7 + $0x10] sm:$0xff] }
 0x240   : > { %716 = vadd.xlane.f32.xlu1 %v715_v45  ;;  %692 = vadd.xlane.f32.xlu0 %v691_v46 }
 0x244   : > { %713 = vadd.xlane.f32.xlu1 %v712_v51  ;;  %689 = vadd.xlane.f32.xlu0 %v688_v52 }
 0x248   : > { %710 = vadd.xlane.f32.xlu1 %v709_v58  ;;  %686 = vadd.xlane.f32.xlu0 %v685_v59 }
 0x24c   : > { %707 = vadd.xlane.f32.xlu1 %v706_v33  ;;  %683 = vadd.xlane.f32.xlu0 %v682_v34 }
 0x250   : > { %704 = vadd.xlane.f32.xlu1 %v703_v37  ;;  %680 = vadd.xlane.f32.xlu0 %v679_v38 }
 0x261   : > { %862 = vperm.xlu1 %1066, %v852_v39  }
 0x265   : > { %867 = vperm.xlu1 %1066, %v853_v40  }
 0x266   : > { %857 = vperm.xlu0 %1065, %v851_v53  }
 0x26a   : > { %872 = vperm.xlu0 %1065, %v854_v41  }
 0x2bd   : > { %v726_v42 = vpop.xlane.xlu0 %725  ;;  %v702_v43 = vpop.xlane.xlu1 %701 }
 0x2be   : > { %v734_v44 = vmax.f32 %v702_v43, %v726_v42 }
 0x2c0   : > { %v742_v45 = vsub.f32 %v702_v43, %v734_v44  ;;  %v766_v46 = vsub.f32 %v726_v42, %v734_v44 }
 0x2c1   : > { %v723_v47 = vpop.xlane.xlu1 %722  ;;  %v699_v48 = vpop.xlane.xlu0 %698 }
 0x2c2   : > { %v757_v49 = vmul.f32 1.442695, %v742_v45  ;;  %v781_v50 = vmul.f32 1.442695, %v766_v46  ;;  %v733_v51 = vmax.f32 %v699_v48, %v723_v47 }
 0x2c4   : > { %1067 = vpow2.f32 %v757_v49  ;;  %v741_v52 = vsub.f32 %v699_v48, %v733_v51  ;;  %v765_v54 = vsub.f32 %v723_v47, %v733_v51 }
 0x2c5   : > { %1069 = vpow2.f32 %v781_v50  ;;  %v720_v55 = vpop.xlane.xlu1 %719  ;;  %v696_v56 = vpop.xlane.xlu0 %695 }
 0x2c6   : > { %v755_v57 = vmul.f32 1.442695, %v741_v52  ;;  %v779_v58 = vmul.f32 1.442695, %v765_v54  ;;  %v732_v59 = vmax.f32 %v696_v56, %v720_v55 }
 0x2c8   : > { %1071 = vpow2.f32 %v755_v57  ;;  %v740_v60 = vsub.f32 %v696_v56, %v732_v59  ;;  %v764_v61 = vsub.f32 %v720_v55, %v732_v59 }
 0x2c9   : > { %1073 = vpow2.f32 %v779_v58  ;;  %v717_v62 = vpop.xlane.xlu1 %716  ;;  %v693_v63 = vpop.xlane.xlu0 %692 }
 0x2ca   : > { %v753_v33 = vmul.f32 1.442695, %v740_v60  ;;  %v777_v34 = vmul.f32 1.442695, %v764_v61  ;;  %v731_v35 = vmax.f32 %v693_v63, %v717_v62 }
 0x2cc   : > { %1075 = vpow2.f32 %v753_v33  ;;  %v739_v36 = vsub.f32 %v693_v63, %v731_v35  ;;  %v763_v37 = vsub.f32 %v717_v62, %v731_v35 }
 0x2cd   : > { %1077 = vpow2.f32 %v777_v34  ;;  %v714_v38 = vpop.xlane.xlu1 %713  ;;  %v690_v39 = vpop.xlane.xlu0 %689 }
 0x2ce   : > { %v751_v40 = vmul.f32 1.442695, %v739_v36  ;;  %v775_v53 = vmul.f32 1.442695, %v763_v37  ;;  %v730_v41 = vmax.f32 %v690_v39, %v714_v38 }
 0x2d0   : > { %1079 = vpow2.f32 %v751_v40  ;;  %v738_v42 = vsub.f32 %v690_v39, %v730_v41  ;;  %v762_v43 = vsub.f32 %v714_v38, %v730_v41 }
 0x2d1   : > { %v1466_v44 = vpop.eup %1067  ;;  %1081 = vpow2.f32 %v775_v53  ;;  %v711_v45 = vpop.xlane.xlu1 %710 }
 0x2d2   : > { %v687_v46 = vpop.xlane.xlu0 %686  ;;  %v1070_v47 = vpop.eup %1069  ;;  %v749_v48 = vmul.f32 1.442695, %v738_v42  ;;  %v773_v49 = vmul.f32 1.442695, %v762_v43 }
 0x2d3   : > { %v729_v50 = vmax.f32 %v687_v46, %v711_v45  ;;  %v790_v51 = vadd.f32 %v1070_v47, %v1466_v44 }
 0x2d4   : > { %1083 = vpow2.f32 %v749_v48 }
 0x2d5   : > { %v737_v52 = vsub.f32 %v687_v46, %v729_v50  ;;  %v761_v54 = vsub.f32 %v711_v45, %v729_v50  ;;  %v1469_v55 = vpop.eup %1071  ;;  %1085 = vpow2.f32 %v773_v49  ;;  %v708_v56 = vpop.xlane.xlu1 %707 }
 0x2d6   : > { %v684_v57 = vpop.xlane.xlu0 %683  ;;  %v1074_v58 = vpop.eup %1073  ;;  %1087 = vrcp.f32 %v790_v51 }
 0x2d7   : > { %v747_v59 = vmul.f32 1.442695, %v737_v52  ;;  %v771_v60 = vmul.f32 1.442695, %v761_v54  ;;  %v728_v61 = vmax.f32 %v684_v57, %v708_v56  ;;  %v789_v62 = vadd.f32 %v1074_v58, %v1469_v55 }
 0x2d9   : > { %1089 = vpow2.f32 %v747_v59  ;;  %v736_v63 = vsub.f32 %v684_v57, %v728_v61  ;;  %v760_v33 = vsub.f32 %v708_v56, %v728_v61  ;;  %v1472_v34 = vpop.eup %1075  ;;  %v705_v35 = vpop.xlane.xlu1 %704 }
 0x2da   : > { %1091 = vrcp.f32 %v789_v62  ;;  %v681_v36 = vpop.xlane.xlu0 %680  ;;  %v1078_v37 = vpop.eup %1077 }
 0x2db   : > { %1093 = vpow2.f32 %v771_v60  ;;  %v745_v38 = vmul.f32 1.442695, %v736_v63  ;;  %v769_v39 = vmul.f32 1.442695, %v760_v33  ;;  %v727_v40 = vmax.f32 %v681_v36, %v705_v35 }
 0x2dc   : > { %v788_v53 = vadd.f32 %v1078_v37, %v1472_v34 }
 0x2dd   : > { %1095 = vpow2.f32 %v745_v38  ;;  %v735_v41 = vsub.f32 %v681_v36, %v727_v40  ;;  %v759_v42 = vsub.f32 %v705_v35, %v727_v40  ;;  %v1475_v43 = vpop.eup %1079 }
 0x2de   : > { %1097 = vrcp.f32 %v788_v53  ;;  %v1082_v45 = vpop.eup %1081 }
 0x2df   : > { %1099 = vpow2.f32 %v769_v39  ;;  %v743_v46 = vmul.f32 1.442695, %v735_v41  ;;  %v767_v48 = vmul.f32 1.442695, %v759_v42  ;;  %v787_v49 = vadd.f32 %v1082_v45, %v1475_v43 }
 0x2e1   : > { %1101 = vpow2.f32 %v743_v46  ;;  %v1478_v50 = vpop.eup %1083 }
 0x2e2   : > { %1103 = vrcp.f32 %v787_v49  ;;  %v1086_v51 = vpop.eup %1085 }
 0x2e3   : > { %1105 = vpow2.f32 %v767_v48  ;;  %v1088_v52 = vpop.eup %1087  ;;  %v786_v54 = vadd.f32 %v1086_v51, %v1478_v50 }
 0x2e4   : > { %v814_v56 = vmul.f32 %v1088_v52, %v1070_v47 }
 0x2e5   : > { %1107 = vrcp.f32 %v786_v54 }
 0x2e6   : > { %v1481_v57 = vpop.eup %1089  ;;  %v846_v60 = vmul.f32 %v814_v56, %v1186_v1  ;;  %v845_v61 = vmul.f32 %v814_v56, %v1188_v2 }
 0x2e7   : > { %v1092_v59 = vpop.eup %1091 }
 0x2e8   : > { %v1094_v62 = vpop.eup %1093  ;;  %v813_v63 = vmul.f32 %v1092_v59, %v1074_v58  ;;  %875 = vmatprep.subr.mxu1 %v846_v60 }
 0x2e9   : > { %v785_v33 = vadd.f32 %v1094_v62, %v1481_v57  ;;  %876 = vmatpush1.msra.mxu1 %v845_v61 }
 0x2ea   : > { %v1486_v35 = vpop.eup %1095  ;;  %v844_v36 = vmul.f32 %v813_v63, %v1190_v3  ;;  %v843_v47 = vmul.f32 %v813_v63, %v1193_v4 }
 0x2eb   : > { %v1098_v38 = vpop.eup %1097  ;;  %1109 = vrcp.f32 %v785_v33 }
 0x2ec   : > { %v1100_v39 = vpop.eup %1099  ;;  %877 = vmatprep.subr.mxu1 %v844_v36  ;;  %v812_v40 = vmul.f32 %v1098_v38, %v1078_v37  ;;  %v802_v36 = vmul.f32 %v1098_v38, %v1472_v34 }
 0x2ed   : > { %v784_v1 = vadd.f32 %v1100_v39, %v1486_v35  ;;  %878 = vmatpush1.msra.mxu1 %v843_v47 }
 0x2ee   : > { %v1491_v2 = vpop.eup %1101  ;;  %v842_v58 = vmul.f32 %v812_v40, %v1196_v5  ;;  %v841_v53 = vmul.f32 %v812_v40, %v1199_v6 }
 0x2ef   : > { %v1104_v41 = vpop.eup %1103  ;;  %1111 = vrcp.f32 %v784_v1 }
 0x2f0   : > { %v1106_v42 = vpop.eup %1105  ;;  %879 = vmatprep.subr.mxu1 %v842_v58  ;;  %v811_v3 = vmul.f32 %v1104_v41, %v1082_v45 }
 0x2f1   : > { %v783_v4 = vadd.f32 %v1106_v42, %v1491_v2  ;;  %880 = vmatpush1.msra.mxu1 %v841_v53 }
 0x2f2   : > { %v840_v46 = vmul.f32 %v811_v3, %v1202_v7  ;;  %v839_v37 = vmul.f32 %v811_v3, %v1205_v8  ;;  %v1108_v48 = vpop.eup %1107 }
 0x2f3   : > { %1113 = vrcp.f32 %v783_v4  ;;  %v810_v49 = vmul.f32 %v1108_v48, %v1086_v51 }
 0x2f4   : > { %881 = vmatprep.subr.mxu1 %v840_v46 }
 0x2f5   : > { %882 = vmatpush1.msra.mxu1 %v839_v37  ;;  %v838_v5 = vmul.f32 %v810_v49, %v1208_v9  ;;  %v837_v6 = vmul.f32 %v810_v49, %v1211_v10  ;;  %v806_v10 = vmul.f32 %v1088_v52, %v1466_v44  ;;  %v800_v44 = vmul.f32 %v1104_v41, %v1475_v43 }
 0x2f7   : > { %883 = vmatprep.subr.mxu1 %v838_v5  ;;  %v830_v33 = vmul.f32 %v806_v10, %v1238_v17  ;;  %v825_v17 = vmul.f32 %v802_v36, %v1258_v22  ;;  %v824_v34 = vmul.f32 %v800_v44, %v1262_v23 }
 0x2f8   : > { %v1110_v54 = vpop.eup %1109  ;;  %884 = vmatpush1.msra.mxu1 %v837_v6 }
 0x2f9   : > { %v809_v45 = vmul.f32 %v1110_v54, %v1094_v62 }
 0x2fb   : > { %v836_v56 = vmul.f32 %v809_v45, %v1214_v11  ;;  %v835_v60 = vmul.f32 %v809_v45, %v1217_v12  ;;  %v804_v12 = vmul.f32 %v1092_v59, %v1469_v55  ;;  %v798_v55 = vmul.f32 %v1108_v48, %v1478_v50  ;;  %v863_v59 = vpop.permute.xlu1 %862 }
 0x2fc   : > { %v1112_v7 = vpop.eup %1111 }
 0x2fd   : > { %885 = vmatprep.subr.mxu1 %v836_v56  ;;  %v808_v8 = vmul.f32 %v1112_v7, %v1100_v39  ;;  %v822_v43 = vmul.f32 %v798_v55, %v1270_v25 }
 0x2fe   : > { %886 = vmatpush1.msra.mxu1 %v835_v60 }
 0x2ff   : > { %v834_v61 = vmul.f32 %v808_v8, %v1220_v13  ;;  %v833_v51 = vmul.f32 %v808_v8, %v1223_v14  ;;  %v829_v13 = vmul.f32 %v806_v10, %v1242_v18  ;;  %v828_v14 = vmul.f32 %v804_v12, %v1246_v19  ;;  %v868_v1 = vpop.permute.xlu1 %867 }
 0x300   : > { %v1114_v63 = vpop.eup %1113  ;;  %v796_v18 = vmul.f32 %v1110_v54, %v1481_v57  ;;  %v823_v19 = vmul.f32 %v800_v44, %v1266_v24 }
 0x301   : > { %887 = vmatprep.subr.mxu1 %v834_v61  ;;  %v807_v9 = vmul.f32 %v1114_v63, %v1106_v42  ;;  %v792_v22 = vmul.f32 %v1114_v63, %v1491_v2 }
 0x302   : > { %888 = vmatpush1.msra.mxu1 %v833_v51  ;;  %v820_v50 = vmul.f32 %v796_v18, %v1278_v27  ;;  %v819_v23 = vmul.f32 %v796_v18, %v1282_v28  ;;  %v847_v27 = vld [vmem:[%s1558_s6] sm:$0xff]  ;;  %v848_v28 = vld [vmem:[%s1558_s6 + $0x8] sm:$0xff] }
 0x303   : > { %v832_v62 = vmul.f32 %v807_v9, %v1231_v15  ;;  %v831_v11 = vmul.f32 %v807_v9, %v1234_v16  ;;  %v827_v15 = vmul.f32 %v804_v12, %v1250_v20  ;;  %v826_v16 = vmul.f32 %v802_v36, %v1254_v21 }
 0x304   : > { %v794_v20 = vmul.f32 %v1112_v7, %v1486_v35  ;;  %v821_v21 = vmul.f32 %v798_v55, %v1274_v26  ;;  %v816_v25 = vmul.f32 %v792_v22, %v1294_v31  ;;  %v815_v26 = vmul.f32 %v792_v22, %v1298_v32  ;;  %v858_v31 = vpop.permute.xlu0 %857 }
 0x305   : > { %889 = vmatprep.subr.mxu1 %v832_v62 }
 0x306   : > { %890 = vmatpush1.msra.mxu1 %v831_v11  ;;  %v818_v52 = vmul.f32 %v794_v20, %v1286_v29  ;;  %v817_v24 = vmul.f32 %v794_v20, %v1290_v30  ;;  %v849_v29 = vld [vmem:[%s1558_s6 + $0x10] sm:$0xff]  ;;  %v850_v30 = vld [vmem:[%s1558_s6 + $0x18] sm:$0xff] }
 0x307   : > { %891 = vmatprep.subr.mxu1 %v830_v33 }
 0x308   : > { %892 = vmatpush1.msra.mxu1 %v829_v13  ;;  %v873_v42 = vpop.permute.xlu0 %872 }
 0x309   : > { %893 = vmatprep.subr.mxu1 %v828_v14 }
 0x30a   : > { %894 = vmatpush1.msra.mxu1 %v827_v15 }
 0x30b   : > { %895 = vmatprep.subr.mxu1 %v826_v16 }
 0x30c   : > { %896 = vmatpush1.msra.mxu1 %v825_v17 }
 0x30d   : > { %897 = vmatprep.subr.mxu1 %v824_v34 }
 0x30e   : > { %898 = vmatpush1.msra.mxu1 %v823_v19 }
 0x30f   : > { %899 = vmatprep.subr.mxu1 %v822_v43 }
 0x310   : > { %900 = vmatpush1.msra.mxu1 %v821_v21 }
 0x311   : > { %901 = vmatprep.subr.mxu1 %v820_v50 }
 0x312   : > { %902 = vmatpush1.msra.mxu1 %v819_v23 }
 0x313   : > { %903 = vmatprep.subr.mxu1 %v818_v52 }
 0x314   : > { %904 = vmatpush1.msra.mxu1 %v817_v24 }
 0x315   : > { %905 = vmatprep.subr.mxu1 %v816_v25 }
 0x316   : > { %906 = vmatpush1.msra.mxu1 %v815_v26 }
 0x317   : > { %940 = vmatmul.mubr.f32.vlgmr.msra.gmra.mxu1 %v847_v27 }
 0x318   : > { %945 = vmatprep.mubr.f32.mxu1 %v1123_v0 }
 0x31b   : > { %946 = vmatmul.mubr.f32.gmra.mxu1 %v848_v28 }
 0x31c   : > { %951 = vmatprep.mubr.f32.mxu1 %v1123_v0 }
 0x31f   : > { %952 = vmatmul.mubr.f32.gmra.mxu1 %v849_v29 }
 0x320   : > { %957 = vmatprep.mubr.f32.mxu1 %v1123_v0 }
 0x323   : > { %958 = vmatmul.mubr.f32.gmra.mxu1 %v850_v30 }
 0x3d7   : > { %v941_v32 = vpop.f32.mrf.mxu1 }
 0x3d8   : > { %v942_v57 = vadd.f32 %v941_v32, %v858_v31 }
 0x3d9   : > { %v943_v35 = vpop.f32.mrf.mxu1 }
 0x3da   : > { %964 = vst [vmem:[%s325_s13] sm:$0xff] %v942_v57  ;;  %v944_v47 = vadd.f32 %v943_v35, %v858_v31 }
 0x3db   : > { %v947_v38 = vpop.f32.mrf.mxu1 }
 0x3dc   : > { %965 = vst [vmem:[%s325_s13 + $0x8] sm:$0xff] %v944_v47  ;;  %v948_v0 = vadd.f32 %v947_v38, %v863_v59 }
 0x3dd   : > { %v949_v39 = vpop.f32.mrf.mxu1 }
 0x3de   : > { %966 = vst [vmem:[%s325_s13 + $0x10] sm:$0xff] %v948_v0  ;;  %v950_v40 = vadd.f32 %v949_v39, %v863_v59 }
 0x3df   : > { %v953_v2 = vpop.f32.mrf.mxu1 }
 0x3e0   : > { %967 = vst [vmem:[%s325_s13 + $0x18] sm:$0xff] %v950_v40  ;;  %v954_v58 = vadd.f32 %v953_v2, %v868_v1 }
 0x3e1   : > { %v955_v53 = vpop.f32.mrf.mxu1 }
 0x3e2   : > { %968 = vst [vmem:[%s325_s13 + $0x20] sm:$0xff] %v954_v58  ;;  %v956_v41 = vadd.f32 %v955_v53, %v868_v1 }
 0x3e3   : > { %v959_v3 = vpop.f32.mrf.mxu1 }
 0x3e4   : > { %969 = vst [vmem:[%s325_s13 + $0x28] sm:$0xff] %v956_v41  ;;  %v960_v4 = vadd.f32 %v959_v3, %v873_v42 }
 0x3e5   : > { %v961_v46 = vpop.f32.mrf.mxu1 }
 0x3e6   : > { %970 = vst [vmem:[%s325_s13 + $0x30] sm:$0xff] %v960_v4  ;;  %v962_v37 = vadd.f32 %v961_v46, %v873_v42 }
 0x3e8   : > { %971 = vst [vmem:[%s325_s13 + $0x38] sm:$0xff] %v962_v37 }
 0x3e9 PF: > { %s18_s27 = sadd.s32 1, %s1121_s27  }
 0x3ea   : > { %p15_p4 = scmp.ge.s32.totalorder %s18_s27, 4  }
 0x3ec   :  { %17 = sbr.rel (!%p15_p4) target bundleno = 1 (0x1), region = 85 }

</bundles_post_ra>
